<compile_context>
chip_gen: v5e
topology: v5e:2x2
jax: 0.10.0
libtpu: 0.0.40
codegen_flags: <defaults>
</compile_context>

<pallas_src>
import functools

import numpy as np
import jax
import jax.numpy as jnp
from jax.experimental import pallas as pl
from jax.experimental.pallas import tpu as pltpu

LANE = 128       # feature dims padded to multiples of the 128-lane vreg width
SUBLANE = 8      # f32 sublane granularity for the row (batch) dimension
_VMEM_BUDGET = 44 << 20   # conservative working-set bound; fits v7x (64 MiB/TC)
# TODO(synk): per-generation VMEM budget (v5e/v6e have 128 MiB physical VMEM and
# could keep much larger weights resident); conservatively sized for v7x here.


def _round_up(n, m):
    return ((n + m - 1) // m) * m


# ----------------------------------------------------------------------------
# Kernels
# ----------------------------------------------------------------------------
def _res_linear_kernel(x_ref, w1_ref, b1_ref, w2_ref, ws_ref, bo_ref, o_ref,
                       *, slope):
    """Weights fully resident in VMEM; grid = row tiles only."""
    x = x_ref[...]
    # deep branch: Linear -> LeakyReLU -> Linear (f32 accumulation)
    h = jnp.dot(x, w1_ref[...], preferred_element_type=jnp.float32) + b1_ref[...]
    h = jnp.where(h >= 0, h, slope * h)
    d = jnp.dot(h.astype(w2_ref.dtype), w2_ref[...],
                preferred_element_type=jnp.float32)
    # shortcut branch
    s = jnp.dot(x, ws_ref[...], preferred_element_type=jnp.float32)
    # residual add + combined bias (bo = b2 + bs) + output LeakyReLU
    y = d + s + bo_ref[...]
    o_ref[...] = jnp.where(y >= 0, y, slope * y).astype(o_ref.dtype)


def _res_linear_kernel_ntiled(x_ref, w1_ref, b1_ref, w2_ref, ws_ref, bo_ref,
                              o_ref, h_ref, *, slope):
    """Large-channel fallback: Kout tiled; h computed once per row tile into a
    VMEM scratch (re-used across all output-column tiles)."""
    @pl.when(pl.program_id(1) == 0)
    def _():
        h = jnp.dot(x_ref[...], w1_ref[...],
                    preferred_element_type=jnp.float32) + b1_ref[...]
        h = jnp.where(h >= 0, h, slope * h)
        h_ref[...] = h.astype(h_ref.dtype)

    d = jnp.dot(h_ref[...], w2_ref[...], preferred_element_type=jnp.float32)
    s = jnp.dot(x_ref[...], ws_ref[...], preferred_element_type=jnp.float32)
    y = d + s + bo_ref[...]
    o_ref[...] = jnp.where(y >= 0, y, slope * y).astype(o_ref.dtype)


# ----------------------------------------------------------------------------
# One-time parameter preparation (hoisted out of the forward pass)
# ----------------------------------------------------------------------------
def prepare_res_linear_params(w1, b1, w2, b2, ws, bs, *, lane=LANE):
    """Transpose to [in, out], zero-pad feature dims to lane multiples, cast the
    matmul operands to bf16 and pre-combine the two output biases.  Call once
    (module init); the forward then pays zero weight-layout traffic."""
    in_c, hid_c, out_c = w1.shape[1], w1.shape[0], w2.shape[0]
    Kin, Khid, Kout = (_round_up(d, lane) for d in (in_c, hid_c, out_c))

    def pad_w(w, rows, cols):
        wt = w.T.astype(jnp.bfloat16)                       # [in, out]
        if wt.shape == (rows, cols):
            return wt
        return jnp.zeros((rows, cols), jnp.bfloat16).at[
            :wt.shape[0], :wt.shape[1]].set(wt)

    def pad_b(b, cols):
        b = b.astype(jnp.float32).reshape(1, -1)
        if b.shape[1] == cols:
            return b
        return jnp.zeros((1, cols), jnp.float32).at[:, :b.shape[1]].set(b)

    return dict(
        w1=pad_w(w1, Kin, Khid),
        b1=pad_b(b1, Khid),
        w2=pad_w(w2, Khid, Kout),
        ws=pad_w(ws, Kin, Kout),
        bo=pad_b(b2.astype(jnp.float32) + bs.astype(jnp.float32), Kout),
        dims=(in_c, hid_c, out_c),
    )


# ----------------------------------------------------------------------------
# Tiling / VMEM sizing
# ----------------------------------------------------------------------------
def _resident_footprint(TM, Kin, Khid, Kout):
    w = 2 * (Kin * Khid + Khid * Kout + Kin * Kout)   # bf16 weights, 1-buffered
    xb = 2 * 2 * TM * Kin                             # bf16 x tile, 2-buffered
    ob = 2 * 4 * TM * Kout                            # f32 out tile, 2-buffered
    live = 4 * TM * (Khid + 2 * Kout)                 # h / d / s f32 temporaries
    return w + xb + ob + live + 4 * (Khid + Kout)


def _tiled_n_footprint(TM, TN, Kin, Khid, Kout):
    w1 = 2 * Kin * Khid                               # resident, 1-buffered
    wb = 2 * 2 * (Khid + Kin) * TN                    # W2/Ws blocks, 2-buffered
    xb = 2 * 2 * TM * Kin
    ob = 2 * 4 * TM * TN
    h = 2 * TM * Khid                                 # bf16 scratch
    live = 4 * TM * (Khid + 2 * TN)
    return w1 + wb + xb + ob + h + live + 4 * (Khid + TN)


def _choose_tiling(M, Kin, Khid, Kout, tile_m, *, tile_n=None,
                   force_tiled_n=False):
    M8 = _round_up(max(M, 1), SUBLANE)

    def row_tile(tm):
        tm = max(SUBLANE, min(_round_up(tm, SUBLANE), M8))
        # prefer >= 2 row tiles so both TensorCores (v7x) get work at small batch
        if M8 > SUBLANE and _round_up(M8, tm) // tm < 2:
            tm = _round_up(-(-M8 // 2), SUBLANE)
        return tm

    TM = row_tile(tile_m)
    if not force_tiled_n:
        while TM > 128 and _resident_footprint(TM, Kin, Khid, Kout) > _VMEM_BUDGET:
            TM = row_tile(TM // 2)
        if _resident_footprint(TM, Kin, Khid, Kout) <= _VMEM_BUDGET:
            return TM, _round_up(M8, TM), False, None

    # Large-channel fallback (primarily v7x 64 MiB/TC): tile Kout as well.
    if tile_n is not None and Kout % _round_up(tile_n, LANE) == 0:
        TN = _round_up(tile_n, LANE)
    else:
        TN = 512 if Kout % 512 == 0 else (256 if Kout % 256 == 0 else LANE)
    TM = row_tile(min(tile_m, 256))
    while ((TM > 128 or TN > LANE)
           and _tiled_n_footprint(TM, TN, Kin, Khid, Kout) > _VMEM_BUDGET):
        if TN > LANE:
            TN //= 2
        else:
            TM = row_tile(TM // 2)
    return TM, _round_up(M8, TM), True, TN


# ----------------------------------------------------------------------------
# Forward wrapper
# ----------------------------------------------------------------------------
def res_linear_forward(x, prepped, *, slope=0.01, tile_m=512, tile_n=None,
                       out_dtype=jnp.float32, force_tiled_n=False):
    """x: [..., in_c] float32.  prepped: output of prepare_res_linear_params."""
    in_c, hid_c, out_c = prepped["dims"]
    w1p, b1p, w2p, wsp, bop = (prepped[k] for k in ("w1", "b1", "w2", "ws", "bo"))
    Kin, Khid = w1p.shape
    Kout = w2p.shape[1]

    orig_shape = x.shape
    assert orig_shape[-1] == in_c, (orig_shape, in_c)
    x2 = x.reshape(-1, in_c)
    M = x2.shape[0]

    TM, Mp, use_tiled_n, TN = _choose_tiling(
        M, Kin, Khid, Kout, tile_m, tile_n=tile_n, force_tiled_n=force_tiled_n)

    # Conditional input padding: aligned inputs skip the extra HBM pass.
    if Mp != M or Kin != in_c:
        xp = jnp.zeros((Mp, Kin), jnp.bfloat16).at[:M, :in_c].set(
            x2.astype(jnp.bfloat16))
    else:
        xp = x2.astype(jnp.bfloat16)

    weight_bytes = 2 * (Kin * Khid + Khid * Kout + Kin * Kout)
    cost = pl.CostEstimate(
        flops=2 * Mp * (Kin * Khid + Khid * Kout + Kin * Kout),
        transcendentals=0,
        bytes_accessed=(Mp * Kin * 2 + weight_bytes + 4 * (Khid + Kout)
                        + Mp * Kout * np.dtype(out_dtype).itemsize),
    )

    def build_call(single_buffered):
        resident = (dict(pipeline_mode=pl.Buffered(1)) if single_buffered else {})
        if not use_tiled_n:
            kernel = functools.partial(_res_linear_kernel, slope=slope)
            grid = (Mp // TM,)
            in_specs = [
                pl.BlockSpec((TM, Kin), lambda i: (i, 0)),              # x tile
                pl.BlockSpec((Kin, Khid), lambda i: (0, 0), **resident),   # W1
                pl.BlockSpec((1, Khid), lambda i: (0, 0), **resident),     # b1
                pl.BlockSpec((Khid, Kout), lambda i: (0, 0), **resident),  # W2
                pl.BlockSpec((Kin, Kout), lambda i: (0, 0), **resident),   # Ws
                pl.BlockSpec((1, Kout), lambda i: (0, 0), **resident),     # b2+bs
            ]
            out_specs = pl.BlockSpec((TM, Kout), lambda i: (i, 0))
            scratch = []
            dims_sem = ("parallel",)
            footprint = _resident_footprint(TM, Kin, Khid, Kout)
        else:
            kernel = functools.partial(_res_linear_kernel_ntiled, slope=slope)
            grid = (Mp // TM, Kout // TN)
            in_specs = [
                pl.BlockSpec((TM, Kin), lambda i, j: (i, 0)),
                pl.BlockSpec((Kin, Khid), lambda i, j: (0, 0), **resident),
                pl.BlockSpec((1, Khid), lambda i, j: (0, 0), **resident),
                pl.BlockSpec((Khid, TN), lambda i, j: (0, j)),
                pl.BlockSpec((Kin, TN), lambda i, j: (0, j)),
                pl.BlockSpec((1, TN), lambda i, j: (0, j)),
            ]
            out_specs = pl.BlockSpec((TM, TN), lambda i, j: (i, j))
            scratch = [pltpu.VMEM((TM, Khid), jnp.bfloat16)]
            dims_sem = ("parallel", "arbitrary")
            footprint = _tiled_n_footprint(TM, TN, Kin, Khid, Kout)

        if not single_buffered:  # constants double-buffered -> account for it
            footprint += weight_bytes if not use_tiled_n else 2 * Kin * Khid
        vmem_limit = int(min(max(int(footprint * 1.2) + (2 << 20), 32 << 20),
                             120 << 20))

        return pl.pallas_call(
            kernel,
            out_shape=jax.ShapeDtypeStruct((Mp, Kout), out_dtype),
            grid_spec=pltpu.PrefetchScalarGridSpec(
                num_scalar_prefetch=0,
                grid=grid,
                in_specs=in_specs,
                out_specs=out_specs,
                scratch_shapes=scratch,
            ),
            compiler_params=pltpu.CompilerParams(
                dimension_semantics=dims_sem,
                vmem_limit_bytes=vmem_limit,
            ),
            cost_estimate=cost,
        )

    try:
        out = build_call(single_buffered=True)(xp, w1p, b1p, w2p, wsp, bop)
    except Exception:
        # Fallback for jax versions where pipeline_mode=pl.Buffered(1) is not
        # accepted on pallas_call operands: let the constants double-buffer.
        out = build_call(single_buffered=False)(xp, w1p, b1p, w2p, wsp, bop)

    if Mp != M or Kout != out_c:
        out = out[:M, :out_c]
    return out.reshape(*orig_shape[:-1], out_c)


# ----------------------------------------------------------------------------
# Module wrapper mirroring ResLinear (default constructor args)
# ----------------------------------------------------------------------------
class ResLinearPallas:
    # TODO(synk): custom linear_layer / norm_layer / non_linear constructor args
    #             are not supported; only the PyTorch defaults are implemented
    #             (nn.Linear, Identity norm, nn.LeakyReLU(negative_slope=0.01)).
    def __init__(self, in_c, out_c, hid_c=None, key=None, slope=0.01,
                 out_dtype=jnp.float32):
        if hid_c is None:
            hid_c = in_c
        if key is None:
            key = jax.random.PRNGKey(0)
        self.slope = float(slope)
        self.out_dtype = out_dtype

        def linear_init(k, fan_in, fan_out):
            # nn.Linear default init: U(-1/sqrt(fan_in), 1/sqrt(fan_in))
            kw, kb = jax.random.split(k)
            bound = 1.0 / (fan_in ** 0.5)
            w = jax.random.uniform(kw, (fan_out, fan_in), jnp.float32, -bound, bound)
            b = jax.random.uniform(kb, (fan_out,), jnp.float32, -bound, bound)
            return w, b

        k1, k2, k3 = jax.random.split(key, 3)
        self.w1, self.b1 = linear_init(k1, in_c, hid_c)    # deep_connect[0]
        self.w2, self.b2 = linear_init(k2, hid_c, out_c)   # deep_connect[3]
        self.ws, self.bs = linear_init(k3, in_c, out_c)    # shortcut_connect

        # Hoisted once: transpose + lane pad + bf16 cast + (b2+bs) bias combine.
        self.prepped = prepare_res_linear_params(
            self.w1, self.b1, self.w2, self.b2, self.ws, self.bs)

    def __call__(self, x):
        return res_linear_forward(x, self.prepped, slope=self.slope,
                                  out_dtype=self.out_dtype)

    def reference(self, x):
        """Pure-JAX f32 reference of the PyTorch forward (for sanity check)."""
        lrelu = lambda v: jnp.where(v >= 0, v, self.slope * v)
        h = lrelu(x @ self.w1.T + self.b1)
        d = h @ self.w2.T + self.b2
        s = x @ self.ws.T + self.bs
        return lrelu(s + d)


if __name__ == "__main__":
    key = jax.random.PRNGKey(0)
    k_x1, k_x2, k_x3, k_p1, k_p2 = jax.random.split(key, 5)
    tol = dict(rtol=5e-2, atol=5e-2)  # bf16 MXU operands, f32 accumulation

    # 1) fully aligned case (no input padding, >=2 row tiles on the parallel axis)
    mod_a = ResLinearPallas(128, 128, key=k_p1)
    x1 = jax.random.normal(k_x1, (16, 128), dtype=jnp.float32)
    y1 = jax.block_until_ready(mod_a(x1))
    r1 = mod_a.reference(x1)
    assert y1.shape == (16, 128), y1.shape
    assert jnp.allclose(y1, r1, **tol), float(jnp.max(jnp.abs(y1 - r1)))

    # 2) un-aligned multi-dim batch (row + lane padding, output slice path)
    mod_b = ResLinearPallas(32, 64, key=k_p1)
    x2 = jax.random.normal(k_x2, (2, 13, 32), dtype=jnp.float32)
    y2 = jax.block_until_ready(mod_b(x2))
    r2 = mod_b.reference(x2)
    assert y2.shape == (2, 13, 64), y2.shape
    assert jnp.allclose(y2, r2, **tol), float(jnp.max(jnp.abs(y2 - r2)))

    # 3) exercise the Kout-tiled (large-channel / v7x) kernel path on small dims
    mod_c = ResLinearPallas(64, 200, key=k_p2)
    x3 = jax.random.normal(k_x3, (16, 64), dtype=jnp.float32)
    y3 = jax.block_until_ready(
        res_linear_forward(x3, mod_c.prepped, slope=mod_c.slope,
                           force_tiled_n=True, tile_n=128))
    r3 = mod_c.reference(x3)
    assert y3.shape == (16, 200), y3.shape
    assert jnp.allclose(y3, r3, **tol), float(jnp.max(jnp.abs(y3 - r3)))

    print("KERNEL_OK")
</pallas_src>

<mosaic_0001>
module attributes {stable_mosaic.version = 11 : i64} {
  func.func @_res_linear_kernel(%arg0: i32, %arg1: memref<8x128xbf16, #tpu.memory_space<vmem>>, %arg2: memref<128x128xbf16, #tpu.memory_space<vmem>>, %arg3: memref<1x128xf32, #tpu.memory_space<vmem>>, %arg4: memref<128x128xbf16, #tpu.memory_space<vmem>>, %arg5: memref<128x128xbf16, #tpu.memory_space<vmem>>, %arg6: memref<1x128xf32, #tpu.memory_space<vmem>>, %arg7: memref<8x128xf32, #tpu.memory_space<vmem>>) attributes {dimension_semantics = [#tpu.dimension_semantics<parallel>], iteration_bounds = array<i64: 2>, scalar_prefetch = 0 : i64, scratch_operands = 0 : i64, tpu.core_type = #tpu.core_type<tc>, window_params = [{transform_indices = @transform_0, window_bounds = array<i64: 8, 128>}, {pipeline_mode = #tpu.pipeline_mode<synchronous>, transform_indices = @transform_1, window_bounds = array<i64: 128, 128>}, {pipeline_mode = #tpu.pipeline_mode<synchronous>, transform_indices = @transform_2, window_bounds = array<i64: 1, 128>}, {pipeline_mode = #tpu.pipeline_mode<synchronous>, transform_indices = @transform_3, window_bounds = array<i64: 128, 128>}, {pipeline_mode = #tpu.pipeline_mode<synchronous>, transform_indices = @transform_4, window_bounds = array<i64: 128, 128>}, {pipeline_mode = #tpu.pipeline_mode<synchronous>, transform_indices = @transform_5, window_bounds = array<i64: 1, 128>}, {transform_indices = @transform_6, window_bounds = array<i64: 8, 128>}]} {
    %c0 = arith.constant 0 : index
    %c0_0 = arith.constant 0 : index
    %0 = vector.load %arg1[%c0, %c0_0] : memref<8x128xbf16, #tpu.memory_space<vmem>>, vector<8x128xbf16>
    %c0_1 = arith.constant 0 : index
    %c0_2 = arith.constant 0 : index
    %1 = vector.load %arg2[%c0_1, %c0_2] : memref<128x128xbf16, #tpu.memory_space<vmem>>, vector<128x128xbf16>
    %cst = arith.constant dense<0.000000e+00> : vector<8x128xf32>
    %2 = tpu.matmul %0, %1, %cst {dimension_numbers = #tpu.dot_dimension_numbers<[1], [0], [0], [1], [0, 0, 1, 1], [], []>} : vector<8x128xbf16>, vector<128x128xbf16>, vector<8x128xf32> -> vector<8x128xf32>
    %c0_3 = arith.constant 0 : index
    %c0_4 = arith.constant 0 : index
    %3 = vector.load %arg3[%c0_3, %c0_4] : memref<1x128xf32, #tpu.memory_space<vmem>>, vector<1x128xf32>
    %4 = vector.broadcast %3 : vector<1x128xf32> to vector<8x128xf32>
    %5 = arith.addf %2, %4 : vector<8x128xf32>
    %cst_5 = arith.constant 0.000000e+00 : f32
    %6 = vector.broadcast %cst_5 : f32 to vector<8x128xf32>
    %7 = arith.cmpf oge, %5, %6 : vector<8x128xf32>
    %cst_6 = arith.constant 0.00999999977 : f32
    %8 = vector.broadcast %cst_6 : f32 to vector<8x128xf32>
    %9 = arith.mulf %8, %5 : vector<8x128xf32>
    %10 = arith.select %7, %5, %9 : vector<8x128xi1>, vector<8x128xf32>
    %11 = arith.truncf %10 : vector<8x128xf32> to vector<8x128xbf16>
    %c0_7 = arith.constant 0 : index
    %c0_8 = arith.constant 0 : index
    %12 = vector.load %arg4[%c0_7, %c0_8] : memref<128x128xbf16, #tpu.memory_space<vmem>>, vector<128x128xbf16>
    %cst_9 = arith.constant dense<0.000000e+00> : vector<8x128xf32>
    %13 = tpu.matmul %11, %12, %cst_9 {dimension_numbers = #tpu.dot_dimension_numbers<[1], [0], [0], [1], [0, 0, 1, 1], [], []>} : vector<8x128xbf16>, vector<128x128xbf16>, vector<8x128xf32> -> vector<8x128xf32>
    %c0_10 = arith.constant 0 : index
    %c0_11 = arith.constant 0 : index
    %14 = vector.load %arg5[%c0_10, %c0_11] : memref<128x128xbf16, #tpu.memory_space<vmem>>, vector<128x128xbf16>
    %cst_12 = arith.constant dense<0.000000e+00> : vector<8x128xf32>
    %15 = tpu.matmul %0, %14, %cst_12 {dimension_numbers = #tpu.dot_dimension_numbers<[1], [0], [0], [1], [0, 0, 1, 1], [], []>} : vector<8x128xbf16>, vector<128x128xbf16>, vector<8x128xf32> -> vector<8x128xf32>
    %16 = arith.addf %13, %15 : vector<8x128xf32>
    %c0_13 = arith.constant 0 : index
    %c0_14 = arith.constant 0 : index
    %17 = vector.load %arg6[%c0_13, %c0_14] : memref<1x128xf32, #tpu.memory_space<vmem>>, vector<1x128xf32>
    %18 = vector.broadcast %17 : vector<1x128xf32> to vector<8x128xf32>
    %19 = arith.addf %16, %18 : vector<8x128xf32>
    %cst_15 = arith.constant 0.000000e+00 : f32
    %20 = vector.broadcast %cst_15 : f32 to vector<8x128xf32>
    %21 = arith.cmpf oge, %19, %20 : vector<8x128xf32>
    %cst_16 = arith.constant 0.00999999977 : f32
    %22 = vector.broadcast %cst_16 : f32 to vector<8x128xf32>
    %23 = arith.mulf %22, %19 : vector<8x128xf32>
    %24 = arith.select %21, %19, %23 : vector<8x128xi1>, vector<8x128xf32>
    %c0_17 = arith.constant 0 : index
    %c0_18 = arith.constant 0 : index
    %25 = vector.load %arg7[%c0_17, %c0_18] : memref<8x128xf32, #tpu.memory_space<vmem>>, vector<8x128xf32>
    tpu.vector_store %arg7[%c0_17, %c0_18], %24 {strides = array<i32>} : memref<8x128xf32, #tpu.memory_space<vmem>>, vector<8x128xf32>,
    return
  }
  func.func @transform_0(%arg0: i32) -> (i32, i32) {
    %c0_i32 = arith.constant 0 : i32
    %c0_i32_0 = arith.constant 0 : i32
    return %arg0, %c0_i32 : i32, i32
  }
  func.func @transform_1(%arg0: i32) -> (i32, i32) {
    %c0_i32 = arith.constant 0 : i32
    %c0_i32_0 = arith.constant 0 : i32
    %c0_i32_1 = arith.constant 0 : i32
    return %c0_i32, %c0_i32_0 : i32, i32
  }
  func.func @transform_2(%arg0: i32) -> (i32, i32) {
    %c0_i32 = arith.constant 0 : i32
    %c0_i32_0 = arith.constant 0 : i32
    %c0_i32_1 = arith.constant 0 : i32
    return %c0_i32, %c0_i32_0 : i32, i32
  }
  func.func @transform_3(%arg0: i32) -> (i32, i32) {
    %c0_i32 = arith.constant 0 : i32
    %c0_i32_0 = arith.constant 0 : i32
    %c0_i32_1 = arith.constant 0 : i32
    return %c0_i32, %c0_i32_0 : i32, i32
  }
  func.func @transform_4(%arg0: i32) -> (i32, i32) {
    %c0_i32 = arith.constant 0 : i32
    %c0_i32_0 = arith.constant 0 : i32
    %c0_i32_1 = arith.constant 0 : i32
    return %c0_i32, %c0_i32_0 : i32, i32
  }
  func.func @transform_5(%arg0: i32) -> (i32, i32) {
    %c0_i32 = arith.constant 0 : i32
    %c0_i32_0 = arith.constant 0 : i32
    %c0_i32_1 = arith.constant 0 : i32
    return %c0_i32, %c0_i32_0 : i32, i32
  }
  func.func @transform_6(%arg0: i32) -> (i32, i32) {
    %c0_i32 = arith.constant 0 : i32
    %c0_i32_0 = arith.constant 0 : i32
    return %arg0, %c0_i32 : i32, i32
  }
}

module attributes {stable_mosaic.version = 11 : i64} {
  func.func @_res_linear_kernel(%arg0: i32, %arg1: memref<8x128xbf16, #tpu.memory_space<vmem>>, %arg2: memref<128x128xbf16, #tpu.memory_space<vmem>>, %arg3: memref<1x128xf32, #tpu.memory_space<vmem>>, %arg4: memref<128x128xbf16, #tpu.memory_space<vmem>>, %arg5: memref<128x128xbf16, #tpu.memory_space<vmem>>, %arg6: memref<1x128xf32, #tpu.memory_space<vmem>>, %arg7: memref<8x128xf32, #tpu.memory_space<vmem>>) attributes {dimension_semantics = [#tpu.dimension_semantics<parallel>], iteration_bounds = array<i64: 2>, scalar_prefetch = 0 : i64, scratch_operands = 0 : i64, tpu.core_type = #tpu.core_type<tc>, window_params = [{transform_indices = @transform_0, window_bounds = array<i64: 8, 128>}, {pipeline_mode = #tpu.pipeline_mode<synchronous>, transform_indices = @transform_1, window_bounds = array<i64: 128, 128>}, {pipeline_mode = #tpu.pipeline_mode<synchronous>, transform_indices = @transform_2, window_bounds = array<i64: 1, 128>}, {pipeline_mode = #tpu.pipeline_mode<synchronous>, transform_indices = @transform_3, window_bounds = array<i64: 128, 128>}, {pipeline_mode = #tpu.pipeline_mode<synchronous>, transform_indices = @transform_4, window_bounds = array<i64: 128, 128>}, {pipeline_mode = #tpu.pipeline_mode<synchronous>, transform_indices = @transform_5, window_bounds = array<i64: 1, 128>}, {transform_indices = @transform_6, window_bounds = array<i64: 8, 128>}]} {
    %c0 = arith.constant 0 : index
    %c0_0 = arith.constant 0 : index
    %0 = vector.load %arg1[%c0, %c0_0] : memref<8x128xbf16, #tpu.memory_space<vmem>>, vector<8x128xbf16>
    %c0_1 = arith.constant 0 : index
    %c0_2 = arith.constant 0 : index
    %1 = vector.load %arg2[%c0_1, %c0_2] : memref<128x128xbf16, #tpu.memory_space<vmem>>, vector<128x128xbf16>
    %cst = arith.constant dense<0.000000e+00> : vector<8x128xf32>
    %2 = tpu.matmul %0, %1, %cst {dimension_numbers = #tpu.dot_dimension_numbers<[1], [0], [0], [1], [0, 0, 1, 1], [], []>} : vector<8x128xbf16>, vector<128x128xbf16>, vector<8x128xf32> -> vector<8x128xf32>
    %c0_3 = arith.constant 0 : index
    %c0_4 = arith.constant 0 : index
    %3 = vector.load %arg3[%c0_3, %c0_4] : memref<1x128xf32, #tpu.memory_space<vmem>>, vector<1x128xf32>
    %4 = vector.broadcast %3 : vector<1x128xf32> to vector<8x128xf32>
    %5 = arith.addf %2, %4 : vector<8x128xf32>
    %cst_5 = arith.constant 0.000000e+00 : f32
    %6 = vector.broadcast %cst_5 : f32 to vector<8x128xf32>
    %7 = arith.cmpf oge, %5, %6 : vector<8x128xf32>
    %cst_6 = arith.constant 0.00999999977 : f32
    %8 = vector.broadcast %cst_6 : f32 to vector<8x128xf32>
    %9 = arith.mulf %8, %5 : vector<8x128xf32>
    %10 = arith.select %7, %5, %9 : vector<8x128xi1>, vector<8x128xf32>
    %11 = arith.truncf %10 : vector<8x128xf32> to vector<8x128xbf16>
    %c0_7 = arith.constant 0 : index
    %c0_8 = arith.constant 0 : index
    %12 = vector.load %arg4[%c0_7, %c0_8] : memref<128x128xbf16, #tpu.memory_space<vmem>>, vector<128x128xbf16>
    %cst_9 = arith.constant dense<0.000000e+00> : vector<8x128xf32>
    %13 = tpu.matmul %11, %12, %cst_9 {dimension_numbers = #tpu.dot_dimension_numbers<[1], [0], [0], [1], [0, 0, 1, 1], [], []>} : vector<8x128xbf16>, vector<128x128xbf16>, vector<8x128xf32> -> vector<8x128xf32>
    %c0_10 = arith.constant 0 : index
    %c0_11 = arith.constant 0 : index
    %14 = vector.load %arg5[%c0_10, %c0_11] : memref<128x128xbf16, #tpu.memory_space<vmem>>, vector<128x128xbf16>
    %cst_12 = arith.constant dense<0.000000e+00> : vector<8x128xf32>
    %15 = tpu.matmul %0, %14, %cst_12 {dimension_numbers = #tpu.dot_dimension_numbers<[1], [0], [0], [1], [0, 0, 1, 1], [], []>} : vector<8x128xbf16>, vector<128x128xbf16>, vector<8x128xf32> -> vector<8x128xf32>
    %16 = arith.addf %13, %15 : vector<8x128xf32>
    %c0_13 = arith.constant 0 : index
    %c0_14 = arith.constant 0 : index
    %17 = vector.load %arg6[%c0_13, %c0_14] : memref<1x128xf32, #tpu.memory_space<vmem>>, vector<1x128xf32>
    %18 = vector.broadcast %17 : vector<1x128xf32> to vector<8x128xf32>
    %19 = arith.addf %16, %18 : vector<8x128xf32>
    %cst_15 = arith.constant 0.000000e+00 : f32
    %20 = vector.broadcast %cst_15 : f32 to vector<8x128xf32>
    %21 = arith.cmpf oge, %19, %20 : vector<8x128xf32>
    %cst_16 = arith.constant 0.00999999977 : f32
    %22 = vector.broadcast %cst_16 : f32 to vector<8x128xf32>
    %23 = arith.mulf %22, %19 : vector<8x128xf32>
    %24 = arith.select %21, %19, %23 : vector<8x128xi1>, vector<8x128xf32>
    %c0_17 = arith.constant 0 : index
    %c0_18 = arith.constant 0 : index
    %25 = vector.load %arg7[%c0_17, %c0_18] : memref<8x128xf32, #tpu.memory_space<vmem>>, vector<8x128xf32>
    tpu.vector_store %arg7[%c0_17, %c0_18], %24 {strides = array<i32>} : memref<8x128xf32, #tpu.memory_space<vmem>>, vector<8x128xf32>,
    return
  }
  func.func @transform_0(%arg0: i32) -> (i32, i32) {
    %c0_i32 = arith.constant 0 : i32
    %c0_i32_0 = arith.constant 0 : i32
    return %arg0, %c0_i32 : i32, i32
  }
  func.func @transform_1(%arg0: i32) -> (i32, i32) {
    %c0_i32 = arith.constant 0 : i32
    %c0_i32_0 = arith.constant 0 : i32
    %c0_i32_1 = arith.constant 0 : i32
    return %c0_i32, %c0_i32_0 : i32, i32
  }
  func.func @transform_2(%arg0: i32) -> (i32, i32) {
    %c0_i32 = arith.constant 0 : i32
    %c0_i32_0 = arith.constant 0 : i32
    %c0_i32_1 = arith.constant 0 : i32
    return %c0_i32, %c0_i32_0 : i32, i32
  }
  func.func @transform_3(%arg0: i32) -> (i32, i32) {
    %c0_i32 = arith.constant 0 : i32
    %c0_i32_0 = arith.constant 0 : i32
    %c0_i32_1 = arith.constant 0 : i32
    return %c0_i32, %c0_i32_0 : i32, i32
  }
  func.func @transform_4(%arg0: i32) -> (i32, i32) {
    %c0_i32 = arith.constant 0 : i32
    %c0_i32_0 = arith.constant 0 : i32
    %c0_i32_1 = arith.constant 0 : i32
    return %c0_i32, %c0_i32_0 : i32, i32
  }
  func.func @transform_5(%arg0: i32) -> (i32, i32) {
    %c0_i32 = arith.constant 0 : i32
    %c0_i32_0 = arith.constant 0 : i32
    %c0_i32_1 = arith.constant 0 : i32
    return %c0_i32, %c0_i32_0 : i32, i32
  }
  func.func @transform_6(%arg0: i32) -> (i32, i32) {
    %c0_i32 = arith.constant 0 : i32
    %c0_i32_0 = arith.constant 0 : i32
    return %arg0, %c0_i32 : i32, i32
  }
}

</mosaic_0001>

<bundles_post_ra>
// kernel: tpu_custom_call.1
= control target key start
LH: loop header
LB: loop body
LE: loop exit
PB: predicated region body
PF: predicated region fallthrough
CT: control target
= control target key end

     0   :  { %11 = vsyncpa [#allocation3], 0  ;;  %s1304_s0 = inlined_call_operand.hbm [shape: bf16[16,128], index: 0, kind: input, shape index: {}]   ;;  %s1305_s1 = inlined_call_operand.hbm [shape: bf16[128,128], index: 1, kind: input, shape index: {}]   ;;  %s1306_s2 = inlined_call_operand.vmem [shape: f32[1,128], index: 2, kind: input, shape index: {}]   ;;  %s1307_s3 = inlined_call_operand.hbm [shape: bf16[128,128], index: 3, kind: input, shape index: {}]   ;;  %s1308_s4 = inlined_call_operand.hbm [shape: bf16[128,128], index: 4, kind: input, shape index: {}]   ;;  %s1309_s5 = inlined_call_operand.vmem [shape: f32[1,128], index: 5, kind: input, shape index: {}]   ;;  %s1310_s6 = inlined_call_operand.hbm [shape: f32[16,128], index: 6, kind: output, shape index: {}]  }
   0x1   :  { %13 = vsyncpa [#allocation3 + $0x1], 0 }
   0x2   :  { %14 = vsyncpa [#allocation6], 0 }
   0x3   :  { %15 = vsyncpa [#allocation9], 0 }
   0x4   :  { %16 = vsyncpa [#allocation4], 0 }
   0x5   :  { %18 = vsyncpa [#allocation4 + $0x1], 0  ;;  %s1138_s21 = smov 0   ;;  %s1140_s22 = smov 0  }
   0x6   :  { %s1142_s23 = smov 0   ;;  %s1144_s24 = smov 0  }
   0x7 LB: > { %s197_s27 = sshll.u32 %s1305_s1, 4  ;;  %s1162_s28 = sadd.s32 4294967295, %s1096_s24   ;;  %s1096_s24 = sphi %s1144_s24, %s1321_s24   ;;  %s1092_s23 = sphi %s1142_s23, %s1320_s23   ;;  %s1088_s22 = sphi %s1140_s22, %s1319_s22   ;;  %s1084_s21 = sphi %s1138_s21, %s1318_s21   ;;  %s198_s27 = int_to_ptr.hbm [resolvable:$true] %s197_s27 }
   0x8   : > { %p684_p0 = scmp.ge.s32.totalorder %s1096_s24, 1  ;;  %p45_p1 = scmp.eq.s32.totalorder %s1162_s28, 0 }
   0x9   : > { %p186_p2 = scmp.lt.s32.totalorder %s1096_s24, 3  ;;  %s1098_s30 = smov [#allocation5]  }
   0xa   : > { %s199_s7 = sshll.u32 %s1098_s30, 4  ;;  %s214_s10 = sshll.u32 %s1307_s3, 4  ;;  %s200_s7 = int_to_ptr.vmem [resolvable:$true] %s199_s7  ;;  %s215_s10 = int_to_ptr.hbm [resolvable:$true] %s214_s10 }
   0xb   : > { %p1167_p3 = pnand %p684_p0, %p186_p2  ;;  %s228_s14 = sshll.u32 %s1308_s4, 4  ;;  %s229_s14 = int_to_ptr.hbm [resolvable:$true] %s228_s14 }
   0xc   : > { %s1099_s15 = smov [#allocation7]   ;;  %s1100_s17 = smov 64  }
   0xd   : > { %p837_p4 = pneg %p1167_p3  ;;  %s216_s16 = sshll.u32 %s1099_s15, 4  ;;  %s217_s16 = int_to_ptr.vmem [resolvable:$true] %s216_s16 }
   0xe   : > { %s1101_s18 = smov 4   ;;  %s1102_s19 = smov [#allocation8]  }
   0xf   : > { %p1179_p6 = pnand %p837_p4, %p45_p1  ;;  %s230_s20 = sshll.u32 %s1102_s19, 4  ;;  %s231_s20 = int_to_ptr.vmem [resolvable:$true] %s230_s20 }
  0x10   : > { %s683_s25 = sadd.s32 4294967294, %s1096_s24   ;;  %s1194_s26 = sadd.s32 1, %s1096_s24  }
  0x11   : > { %840 = dma.hbm_to_vmem [thread:$0]  (!%p1179_p6), %s198_s27, 1024, %s200_s7, [#allocation6], %s1100_s17, %s1100_s17, %s1101_s18  }
  0x12   : > { %843 = dma.hbm_to_vmem [thread:$0]  (!%p1179_p6), %s215_s10, 1024, %s217_s16, [#allocation6], %s1100_s17, %s1100_s17, %s1101_s18  }
  0x13   : > { %846 = dma.hbm_to_vmem [thread:$0]  (!%p1179_p6), %s229_s14, 1024, %s231_s20, [#allocation9], %s1100_s17, %s1100_s17, %s1101_s18  }
  0x14   : > { %s31_s30 = sadd.s32 1, %s1092_s23  ;;  %s28_s27 = ssub.s32 %s1096_s24, %s1194_s26 }
  0x15   : > { %p38_p7 = scmp.ne.s32.totalorder %s1092_s23, %s1088_s22  ;;  %p29_p8 = scmp.eq.s32.totalorder %s28_s27, 0 }
  0x16   : > { %p39_p9 = scmp.eq.s32.totalorder %s1096_s24, 0  ;;  %p44_p10 = scmp.ne.s32.totalorder %s1088_s22, %s1084_s21 }
  0x17   : > { %p173_p11 = scmp.eq.s32.totalorder %s1162_s28, 1  ;;  %p179_p0 = scmp.eq.s32.totalorder %s683_s25, 1 }
  0x18   : > { %s1206_s7 = scalar_select %p29_p8, %s1092_s23, %s31_s30  }
  0x19   : > { %p1210_p12 = por %p45_p1, %p44_p10  ;;  %p1214_p13 = por %p173_p11, %p38_p7 }
  0x1a   : > { %p40_p2 = por %p39_p9, %p38_p7  ;;  %s247_s10 = sand.u32 1, %s1092_s23  }
  0x1b   : > { %p1219_p4 = por %p179_p0, %p44_p10  ;;  %p858_p6 = scmp.lt.s32.totalorder %s1096_s24, 2 }
  0x1c   : > { %s689_s12 = sshll.u32 %s247_s10, 2  ;;  %s690_s13 = sshll.u32 %s1096_s24, 2 }
  0x1d   : > { %s255_s16 = scalar_lea.hbm %s1304_s0, %s690_s13  ;;  %s251_s18 = scalar_lea.vmem [#allocation2], %s689_s12 }
  0x1e   : > { %s257_s17 = sshll.u32 %s255_s16, 4  ;;  %s259_s19 = sshll.u32 %s251_s18, 4  ;;  %s258_s17 = int_to_ptr.hbm [resolvable:$true] %s257_s17  ;;  %s260_s19 = int_to_ptr.vmem [resolvable:$true] %s259_s19 }
  0x1f   : > { %p1228_p8 = pnand %p858_p6, %p40_p2  ;;  %s248_s25 = scalar_lea.sflag [#allocation3], %s247_s10 }
  0x20   : > { %s992_s30 = sshra.s32 %s258_s17, 4  ;;  %s999_s12 = scalar_lea.hbm %s1304_s0, 8  ;;  %s993_s30 = int_to_ptr.hbm [resolvable:$true] %s992_s30 }
  0x21   : > { %s994_s27 = scalar_lea.hbm %s993_s30, 4  ;;  %p996_p9 = pneg %p1228_p8 }
  0x22   : > { %p995_p7 = scmp.ne.s32.totalorder %s993_s30, %s994_s27  ;;  %p1000_p0 = scmp.lt.s32.totalorder %s993_s30, %s1304_s0 }
  0x23   : > { %p1001_p2 = scmp.lt.s32.totalorder %s999_s12, %s994_s27 }
  0x24   : > { %p997_p10 = pnand %p996_p9, %p995_p7 }
  0x25   : > { %p1002_p6 = por %p1001_p2, %p1000_p0 }
  0x26   : > { %p998_p11 = pneg %p997_p10 }
  0x28   : > { %p1003_p5 = pnand %p1002_p6, %p998_p11 }
  0x2a   : > { %1006 = shalt.err (!%p1003_p5)
}
  0x2b   : > { %850 = dma.hbm_to_vmem [thread:$0]  (!%p1228_p8), %s258_s17, 64, %s260_s19, %s248_s25  }
  0x2c   : > { %268 = sbr.rel (%p1167_p3) target bundleno = 361 (0x169), region = 44  ;;  %s1245_s10 = sand.u32 (!%p1167_p3), 1, %s1088_s22  }
  0x2d   : > { %s692_s18 = sshll.u32 (!%p1167_p3), %s1245_s10, 2  ;;  %s271_s13 = scalar_lea.sflag (!%p1167_p3), [#allocation3], %s1245_s10 }
  0x2e   : > { %s1249_s14 = scalar_lea.vmem (!%p1167_p3), [#allocation2], %s692_s18 }
  0x31   : > { %1067 = dma.done.wait (%p1210_p12), %s271_s13, 64  }
  0x32   : > { %1069 = vsyncadd (%p1210_p12), %s271_s13, 4294967232 }
  0x33   : > { %1071 = dma.done.wait (%p45_p1), [#allocation6], 2048  }
  0x34   : > { %1073 = vsyncadd (%p45_p1), [#allocation6], 4294965248 }
  0x35   : > { %1075 = dma.done.wait (%p45_p1), [#allocation9], 1024  }
  0x36   : > { %1077 = vsyncadd (%p45_p1), [#allocation9], 4294966272  ;;  %v804_v0 = vld [vmem:[#allocation5 + $0x38] sm:$0xff]  ;;  %v803_v1 = vld [vmem:[#allocation5 + $0x30] sm:$0xff]  ;;  %s696_s17 = sshll.u32 %s1245_s10, 3  ;;  %s794_s19 = sshll.u32 %s1162_s28, 3 }
  0x37   : > { %388 = vmatpush.bf16.msra.mxu0 %v804_v0  ;;  %v820_v2 = vld [vmem:[#allocation8 + $0x38] sm:$0xff]  ;;  %v819_v4 = vld [vmem:[#allocation8 + $0x30] sm:$0xff]  ;;  %v802_v6 = vld [vmem:[#allocation5 + $0x28] sm:$0xff]  ;;  %s579_s12 = scalar_lea.hbm %s1310_s6, %s794_s19  ;;  %s318_s15 = scalar_lea.vmem [#allocation10], %s696_s17 }
  0x38   : > { %v812_v3 = vld [vmem:[#allocation7 + $0x38] sm:$0xff]  ;;  %485 = vmatpush.bf16.msra.mxu1 %v820_v2  ;;  %v811_v5 = vld [vmem:[#allocation7 + $0x30] sm:$0xff]  ;;  %v818_v7 = vld [vmem:[#allocation8 + $0x28] sm:$0xff]  ;;  %s581_s16 = sshll.u32 %s318_s15, 4  ;;  %s583_s18 = sshll.u32 %s579_s12, 4  ;;  %s582_s16 = int_to_ptr.vmem [resolvable:$true] %s581_s16  ;;  %s584_s18 = int_to_ptr.hbm [resolvable:$true] %s583_s18 }
  0x39   : > { %546 = vmatpush.bf16.msra.mxu2 %v812_v3  ;;  %v810_v8 = vld [vmem:[#allocation7 + $0x28] sm:$0xff]  ;;  %v801_v9 = vld [vmem:[#allocation5 + $0x20] sm:$0xff]  ;;  %v800_v12 = vld [vmem:[#allocation5 + $0x18] sm:$0xff]  ;;  %s569_s28 = scalar_lea.sflag [#allocation4], %s1245_s10  ;;  %s1036_s13 = sshra.s32 %s584_s18, 4  ;;  %s1037_s13 = int_to_ptr.hbm [resolvable:$true] %s1036_s13 }
  0x3a   : > { %v817_v10 = vld [vmem:[#allocation8 + $0x20] sm:$0xff]  ;;  %v816_v13 = vld [vmem:[#allocation8 + $0x18] sm:$0xff]  ;;  %v799_v15 = vld [vmem:[#allocation5 + $0x10] sm:$0xff]  ;;  %s1042_s17 = scalar_lea.hbm %s1310_s6, 16  ;;  %p1043_p12 = scmp.lt.s32.totalorder %s1037_s13, %s1310_s6 }
  0x3b   : > { %389 = vmatpush.bf16.msra.mxu0 %v803_v1  ;;  %v809_v11 = vld [vmem:[#allocation7 + $0x20] sm:$0xff]  ;;  %v808_v14 = vld [vmem:[#allocation7 + $0x18] sm:$0xff]  ;;  %v815_v16 = vld [vmem:[#allocation8 + $0x10] sm:$0xff] }
  0x3c   : > { %486 = vmatpush.bf16.msra.mxu1 %v819_v4  ;;  %v807_v17 = vld [vmem:[#allocation7 + $0x10] sm:$0xff]  ;;  %v798_v18 = vld [vmem:[#allocation5 + $0x8] sm:$0xff]  ;;  %v797_v20 = vld [vmem:[#allocation5] sm:$0xff] }
  0x3d   : > { %547 = vmatpush.bf16.msra.mxu2 %v811_v5  ;;  %v814_v19 = vld [vmem:[#allocation8 + $0x8] sm:$0xff]  ;;  %v319_v21 = vld [vmem:[%s1249_s14] sm:$0xf]  ;;  %v813_v23 = vld [vmem:[#allocation8] sm:$0xff]  ;;  %s1038_s14 = scalar_lea.hbm %s1037_s13, 8 }
  0x3e   : > { %v806_v22 = vld [vmem:[#allocation7 + $0x8] sm:$0xff]  ;;  %v805_v24 = vld [vmem:[#allocation7] sm:$0xff]  ;;  %v900_v25 = vld [vmem:[%s1306_s2] ss:$0 sm:$0xff]  ;;  %p1039_p1 = scmp.ne.s32.totalorder %s1037_s13, %s1038_s14  ;;  %p1044_p8 = scmp.lt.s32.totalorder %s1042_s17, %s1038_s14 }
  0x3f   : > { %390 = vmatpush.bf16.msra.mxu0 %v802_v6  ;;  %v901_v34 = vld [vmem:[%s1309_s5] ss:$0 sm:$0xff] }
  0x40   : > { %487 = vmatpush.bf16.msra.mxu1 %v818_v7  ;;  %p1040_p3 = pnand %p1039_p1, %p1214_p13  ;;  %p1045_p7 = por %p1044_p8, %p1043_p12 }
  0x41   : > { %548 = vmatpush.bf16.msra.mxu2 %v810_v8 }
  0x42   : > { %p1041_p5 = pneg %p1040_p3 }
  0x43   : > { %391 = vmatpush.bf16.msra.mxu0 %v801_v9 }
  0x44   : > { %488 = vmatpush.bf16.msra.mxu1 %v817_v10  ;;  %p1046_p9 = pnand %p1045_p7, %p1041_p5 }
  0x45   : > { %549 = vmatpush.bf16.msra.mxu2 %v809_v11 }
  0x47   : > { %392 = vmatpush.bf16.msra.mxu0 %v800_v12 }
  0x48   : > { %489 = vmatpush.bf16.msra.mxu1 %v816_v13 }
  0x49   : > { %550 = vmatpush.bf16.msra.mxu2 %v808_v14 }
  0x4b   : > { %393 = vmatpush.bf16.msra.mxu0 %v799_v15 }
  0x4c   : > { %490 = vmatpush.bf16.msra.mxu1 %v815_v16 }
  0x4d   : > { %551 = vmatpush.bf16.msra.mxu2 %v807_v17 }
  0x4f   : > { %394 = vmatpush.bf16.msra.mxu0 %v798_v18 }
  0x50   : > { %491 = vmatpush.bf16.msra.mxu1 %v814_v19 }
  0x51   : > { %552 = vmatpush.bf16.msra.mxu2 %v806_v22 }
  0x53   : > { %395 = vmatpush.bf16.msra.mxu0 %v797_v20 }
  0x54   : > { %492 = vmatpush.bf16.msra.mxu1 %v813_v23 }
  0x55   : > { %553 = vmatpush.bf16.msra.mxu2 %v805_v24 }
  0x56   : > { %396 = vmatmul.bf16.vlgmr.msra.gmra.mxu0 %v319_v21 }
  0x57   : > { %493 = vmatmul.bf16.vlgmr.msra.gmra.mxu1 %v319_v21 }
  0xd3   : > { %v397_v26 = vpop.f32.mrf.mxu0 }
  0xd4   : > { %v398_v27 = vadd.f32 %v900_v25, %v397_v26  ;;  %v494_v32 = vpop.f32.mrf.mxu1 }
  0xd6   : > { %v402_v28 = vmul.f32 0.01, %v398_v27  ;;  %vm401_vm0 = vcmp.ge.f32.partialorder %v398_v27, 0.0 }
  0xd8   : > { %v403_v29 = vsel %vm401_vm0, %v398_v27, %v402_v28 }
  0xd9   : > { %v404_v30 = vpack.c.bf16 %v403_v29, %v403_v29 }
  0xdb   : > { %v399_v31 = vpop.f32.mrf.mxu0  ;;  %554 = vmatmul.bf16.vlgmr.msra.gmra.mxu2 %v404_v30 }
  0xdc   : > { %v496_v33 = vpop.f32.mrf.mxu1 }
 0x15e   : > { %v555_v35 = vpop.f32.mrf.mxu2 }
 0x15f   : > { %v556_v36 = vadd.f32 %v555_v35, %v494_v32 }
 0x161   : > { %v563_v37 = vadd.f32 %v901_v34, %v556_v36 }
 0x163   : > { %vm564_vm1 = vcmp.ge.f32.partialorder %v563_v37, 0.0  ;;  %v565_v38 = vmul.f32 0.01, %v563_v37 }
 0x165   : > { %v566_v39 = vsel %vm564_vm1, %v563_v37, %v565_v38 }
 0x166   : > { %v557_v40 = vpop.f32.mrf.mxu2  ;;  %567 = vst [vmem:[%s318_s15] sm:$0xff] %v566_v39 }
 0x167   : > { %1049 = shalt.err (!%p1046_p9)
}
 0x168   : > { %835 = dma.vmem_to_hbm [thread:$0]  (%p1214_p13), %s582_s16, 128, %s584_s18, %s569_s28  }
 0x169 PF: > { %s595_s10 = sand.u32 1, %s1084_s21   ;;  %p1317_p10 = scmp.ge.s32.totalorder %s1096_s24, 2 }
 0x16a   : > { %s596_s25 = scalar_lea.sflag [#allocation4], %s595_s10 }
 0x16b   : > { %p852_p11 = pnand %p1317_p10, %p1219_p4 }
 0x16d   : > { %p853_p0 = pneg %p852_p11 }
 0x16f   : > { %1079 = dma.done.wait (%p853_p0), %s596_s25, 128  }
 0x170   : > { %1081 = vsyncadd (%p853_p0), %s596_s25, 4294967168  ;;  %p21_p2 = scmp.ge.s32.totalorder %s1194_s26, 4   ;;  %s1318_s21 = smov %s1088_s22 }
 0x171   : > { %s1319_s22 = smov %s1092_s23  ;;  %s1320_s23 = smov %s1206_s7 }
 0x172   : > { %s1321_s24 = smov %s1194_s26  ;;  %23 = sbr.rel (!%p21_p2) target bundleno = 7 (0x7), region = 101 }
 0x177   :  { %602 = vsyncpa [#allocation3], 1 }
 0x178   :  { %604 = vsyncpa [#allocation3 + $0x1], 1 }
 0x179   :  { %605 = vsyncpa [#allocation6], 1 }
 0x17a   :  { %606 = vsyncpa [#allocation9], 1 }
 0x17b   :  { %607 = vsyncpa [#allocation4], 1 }
 0x17c   :  { %609 = vsyncpa [#allocation4 + $0x1], 1 }

// kernel: tpu_custom_call.1
= control target key start
LH: loop header
LB: loop body
LE: loop exit
PB: predicated region body
PF: predicated region fallthrough
CT: control target
= control target key end

     0   :  { %11 = vsyncpa [#allocation3], 0  ;;  %s1304_s0 = inlined_call_operand.hbm [shape: bf16[16,128], index: 0, kind: input, shape index: {}]   ;;  %s1305_s1 = inlined_call_operand.hbm [shape: bf16[128,128], index: 1, kind: input, shape index: {}]   ;;  %s1306_s2 = inlined_call_operand.vmem [shape: f32[1,128], index: 2, kind: input, shape index: {}]   ;;  %s1307_s3 = inlined_call_operand.hbm [shape: bf16[128,128], index: 3, kind: input, shape index: {}]   ;;  %s1308_s4 = inlined_call_operand.hbm [shape: bf16[128,128], index: 4, kind: input, shape index: {}]   ;;  %s1309_s5 = inlined_call_operand.vmem [shape: f32[1,128], index: 5, kind: input, shape index: {}]   ;;  %s1310_s6 = inlined_call_operand.hbm [shape: f32[16,128], index: 6, kind: output, shape index: {}]  }
   0x1   :  { %13 = vsyncpa [#allocation3 + $0x1], 0 }
   0x2   :  { %14 = vsyncpa [#allocation6], 0 }
   0x3   :  { %15 = vsyncpa [#allocation9], 0 }
   0x4   :  { %16 = vsyncpa [#allocation4], 0 }
   0x5   :  { %18 = vsyncpa [#allocation4 + $0x1], 0  ;;  %s1138_s21 = smov 0   ;;  %s1140_s22 = smov 0  }
   0x6   :  { %s1142_s23 = smov 0   ;;  %s1144_s24 = smov 0  }
   0x7 LB: > { %s197_s27 = sshll.u32 %s1305_s1, 4  ;;  %s1162_s28 = sadd.s32 4294967295, %s1096_s24   ;;  %s1096_s24 = sphi %s1144_s24, %s1321_s24   ;;  %s1092_s23 = sphi %s1142_s23, %s1320_s23   ;;  %s1088_s22 = sphi %s1140_s22, %s1319_s22   ;;  %s1084_s21 = sphi %s1138_s21, %s1318_s21   ;;  %s198_s27 = int_to_ptr.hbm [resolvable:$true] %s197_s27 }
   0x8   : > { %p684_p0 = scmp.ge.s32.totalorder %s1096_s24, 1  ;;  %p45_p1 = scmp.eq.s32.totalorder %s1162_s28, 0 }
   0x9   : > { %p186_p2 = scmp.lt.s32.totalorder %s1096_s24, 3  ;;  %s1098_s30 = smov [#allocation5]  }
   0xa   : > { %s199_s7 = sshll.u32 %s1098_s30, 4  ;;  %s214_s10 = sshll.u32 %s1307_s3, 4  ;;  %s200_s7 = int_to_ptr.vmem [resolvable:$true] %s199_s7  ;;  %s215_s10 = int_to_ptr.hbm [resolvable:$true] %s214_s10 }
   0xb   : > { %p1167_p3 = pnand %p684_p0, %p186_p2  ;;  %s228_s14 = sshll.u32 %s1308_s4, 4  ;;  %s229_s14 = int_to_ptr.hbm [resolvable:$true] %s228_s14 }
   0xc   : > { %s1099_s15 = smov [#allocation7]   ;;  %s1100_s17 = smov 64  }
   0xd   : > { %p837_p4 = pneg %p1167_p3  ;;  %s216_s16 = sshll.u32 %s1099_s15, 4  ;;  %s217_s16 = int_to_ptr.vmem [resolvable:$true] %s216_s16 }
   0xe   : > { %s1101_s18 = smov 4   ;;  %s1102_s19 = smov [#allocation8]  }
   0xf   : > { %p1179_p6 = pnand %p837_p4, %p45_p1  ;;  %s230_s20 = sshll.u32 %s1102_s19, 4  ;;  %s231_s20 = int_to_ptr.vmem [resolvable:$true] %s230_s20 }
  0x10   : > { %s683_s25 = sadd.s32 4294967294, %s1096_s24   ;;  %s1194_s26 = sadd.s32 1, %s1096_s24  }
  0x11   : > { %840 = dma.hbm_to_vmem [thread:$0]  (!%p1179_p6), %s198_s27, 1024, %s200_s7, [#allocation6], %s1100_s17, %s1100_s17, %s1101_s18  }
  0x12   : > { %843 = dma.hbm_to_vmem [thread:$0]  (!%p1179_p6), %s215_s10, 1024, %s217_s16, [#allocation6], %s1100_s17, %s1100_s17, %s1101_s18  }
  0x13   : > { %846 = dma.hbm_to_vmem [thread:$0]  (!%p1179_p6), %s229_s14, 1024, %s231_s20, [#allocation9], %s1100_s17, %s1100_s17, %s1101_s18  }
  0x14   : > { %s31_s30 = sadd.s32 1, %s1092_s23  ;;  %s28_s27 = ssub.s32 %s1096_s24, %s1194_s26 }
  0x15   : > { %p38_p7 = scmp.ne.s32.totalorder %s1092_s23, %s1088_s22  ;;  %p29_p8 = scmp.eq.s32.totalorder %s28_s27, 0 }
  0x16   : > { %p39_p9 = scmp.eq.s32.totalorder %s1096_s24, 0  ;;  %p44_p10 = scmp.ne.s32.totalorder %s1088_s22, %s1084_s21 }
  0x17   : > { %p173_p11 = scmp.eq.s32.totalorder %s1162_s28, 1  ;;  %p179_p0 = scmp.eq.s32.totalorder %s683_s25, 1 }
  0x18   : > { %s1206_s7 = scalar_select %p29_p8, %s1092_s23, %s31_s30  }
  0x19   : > { %p1210_p12 = por %p45_p1, %p44_p10  ;;  %p1214_p13 = por %p173_p11, %p38_p7 }
  0x1a   : > { %p40_p2 = por %p39_p9, %p38_p7  ;;  %s247_s10 = sand.u32 1, %s1092_s23  }
  0x1b   : > { %p1219_p4 = por %p179_p0, %p44_p10  ;;  %p858_p6 = scmp.lt.s32.totalorder %s1096_s24, 2 }
  0x1c   : > { %s689_s12 = sshll.u32 %s247_s10, 2  ;;  %s690_s13 = sshll.u32 %s1096_s24, 2 }
  0x1d   : > { %s255_s16 = scalar_lea.hbm %s1304_s0, %s690_s13  ;;  %s251_s18 = scalar_lea.vmem [#allocation2], %s689_s12 }
  0x1e   : > { %s257_s17 = sshll.u32 %s255_s16, 4  ;;  %s259_s19 = sshll.u32 %s251_s18, 4  ;;  %s258_s17 = int_to_ptr.hbm [resolvable:$true] %s257_s17  ;;  %s260_s19 = int_to_ptr.vmem [resolvable:$true] %s259_s19 }
  0x1f   : > { %p1228_p8 = pnand %p858_p6, %p40_p2  ;;  %s248_s25 = scalar_lea.sflag [#allocation3], %s247_s10 }
  0x20   : > { %s992_s30 = sshra.s32 %s258_s17, 4  ;;  %s999_s12 = scalar_lea.hbm %s1304_s0, 8  ;;  %s993_s30 = int_to_ptr.hbm [resolvable:$true] %s992_s30 }
  0x21   : > { %s994_s27 = scalar_lea.hbm %s993_s30, 4  ;;  %p996_p9 = pneg %p1228_p8 }
  0x22   : > { %p995_p7 = scmp.ne.s32.totalorder %s993_s30, %s994_s27  ;;  %p1000_p0 = scmp.lt.s32.totalorder %s993_s30, %s1304_s0 }
  0x23   : > { %p1001_p2 = scmp.lt.s32.totalorder %s999_s12, %s994_s27 }
  0x24   : > { %p997_p10 = pnand %p996_p9, %p995_p7 }
  0x25   : > { %p1002_p6 = por %p1001_p2, %p1000_p0 }
  0x26   : > { %p998_p11 = pneg %p997_p10 }
  0x28   : > { %p1003_p5 = pnand %p1002_p6, %p998_p11 }
  0x2a   : > { %1006 = shalt.err (!%p1003_p5)
}
  0x2b   : > { %850 = dma.hbm_to_vmem [thread:$0]  (!%p1228_p8), %s258_s17, 64, %s260_s19, %s248_s25  }
  0x2c   : > { %268 = sbr.rel (%p1167_p3) target bundleno = 361 (0x169), region = 44  ;;  %s1245_s10 = sand.u32 (!%p1167_p3), 1, %s1088_s22  }
  0x2d   : > { %s692_s18 = sshll.u32 (!%p1167_p3), %s1245_s10, 2  ;;  %s271_s13 = scalar_lea.sflag (!%p1167_p3), [#allocation3], %s1245_s10 }
  0x2e   : > { %s1249_s14 = scalar_lea.vmem (!%p1167_p3), [#allocation2], %s692_s18 }
  0x31   : > { %1067 = dma.done.wait (%p1210_p12), %s271_s13, 64  }
  0x32   : > { %1069 = vsyncadd (%p1210_p12), %s271_s13, 4294967232 }
  0x33   : > { %1071 = dma.done.wait (%p45_p1), [#allocation6], 2048  }
  0x34   : > { %1073 = vsyncadd (%p45_p1), [#allocation6], 4294965248 }
  0x35   : > { %1075 = dma.done.wait (%p45_p1), [#allocation9], 1024  }
  0x36   : > { %1077 = vsyncadd (%p45_p1), [#allocation9], 4294966272  ;;  %v804_v0 = vld [vmem:[#allocation5 + $0x38] sm:$0xff]  ;;  %v803_v1 = vld [vmem:[#allocation5 + $0x30] sm:$0xff]  ;;  %s696_s17 = sshll.u32 %s1245_s10, 3  ;;  %s794_s19 = sshll.u32 %s1162_s28, 3 }
  0x37   : > { %388 = vmatpush.bf16.msra.mxu0 %v804_v0  ;;  %v820_v2 = vld [vmem:[#allocation8 + $0x38] sm:$0xff]  ;;  %v819_v4 = vld [vmem:[#allocation8 + $0x30] sm:$0xff]  ;;  %v802_v6 = vld [vmem:[#allocation5 + $0x28] sm:$0xff]  ;;  %s579_s12 = scalar_lea.hbm %s1310_s6, %s794_s19  ;;  %s318_s15 = scalar_lea.vmem [#allocation10], %s696_s17 }
  0x38   : > { %v812_v3 = vld [vmem:[#allocation7 + $0x38] sm:$0xff]  ;;  %485 = vmatpush.bf16.msra.mxu1 %v820_v2  ;;  %v811_v5 = vld [vmem:[#allocation7 + $0x30] sm:$0xff]  ;;  %v818_v7 = vld [vmem:[#allocation8 + $0x28] sm:$0xff]  ;;  %s581_s16 = sshll.u32 %s318_s15, 4  ;;  %s583_s18 = sshll.u32 %s579_s12, 4  ;;  %s582_s16 = int_to_ptr.vmem [resolvable:$true] %s581_s16  ;;  %s584_s18 = int_to_ptr.hbm [resolvable:$true] %s583_s18 }
  0x39   : > { %546 = vmatpush.bf16.msra.mxu2 %v812_v3  ;;  %v810_v8 = vld [vmem:[#allocation7 + $0x28] sm:$0xff]  ;;  %v801_v9 = vld [vmem:[#allocation5 + $0x20] sm:$0xff]  ;;  %v800_v12 = vld [vmem:[#allocation5 + $0x18] sm:$0xff]  ;;  %s569_s28 = scalar_lea.sflag [#allocation4], %s1245_s10  ;;  %s1036_s13 = sshra.s32 %s584_s18, 4  ;;  %s1037_s13 = int_to_ptr.hbm [resolvable:$true] %s1036_s13 }
  0x3a   : > { %v817_v10 = vld [vmem:[#allocation8 + $0x20] sm:$0xff]  ;;  %v816_v13 = vld [vmem:[#allocation8 + $0x18] sm:$0xff]  ;;  %v799_v15 = vld [vmem:[#allocation5 + $0x10] sm:$0xff]  ;;  %s1042_s17 = scalar_lea.hbm %s1310_s6, 16  ;;  %p1043_p12 = scmp.lt.s32.totalorder %s1037_s13, %s1310_s6 }
  0x3b   : > { %389 = vmatpush.bf16.msra.mxu0 %v803_v1  ;;  %v809_v11 = vld [vmem:[#allocation7 + $0x20] sm:$0xff]  ;;  %v808_v14 = vld [vmem:[#allocation7 + $0x18] sm:$0xff]  ;;  %v815_v16 = vld [vmem:[#allocation8 + $0x10] sm:$0xff] }
  0x3c   : > { %486 = vmatpush.bf16.msra.mxu1 %v819_v4  ;;  %v807_v17 = vld [vmem:[#allocation7 + $0x10] sm:$0xff]  ;;  %v798_v18 = vld [vmem:[#allocation5 + $0x8] sm:$0xff]  ;;  %v797_v20 = vld [vmem:[#allocation5] sm:$0xff] }
  0x3d   : > { %547 = vmatpush.bf16.msra.mxu2 %v811_v5  ;;  %v814_v19 = vld [vmem:[#allocation8 + $0x8] sm:$0xff]  ;;  %v319_v21 = vld [vmem:[%s1249_s14] sm:$0xf]  ;;  %v813_v23 = vld [vmem:[#allocation8] sm:$0xff]  ;;  %s1038_s14 = scalar_lea.hbm %s1037_s13, 8 }
  0x3e   : > { %v806_v22 = vld [vmem:[#allocation7 + $0x8] sm:$0xff]  ;;  %v805_v24 = vld [vmem:[#allocation7] sm:$0xff]  ;;  %v900_v25 = vld [vmem:[%s1306_s2] ss:$0 sm:$0xff]  ;;  %p1039_p1 = scmp.ne.s32.totalorder %s1037_s13, %s1038_s14  ;;  %p1044_p8 = scmp.lt.s32.totalorder %s1042_s17, %s1038_s14 }
  0x3f   : > { %390 = vmatpush.bf16.msra.mxu0 %v802_v6  ;;  %v901_v34 = vld [vmem:[%s1309_s5] ss:$0 sm:$0xff] }
  0x40   : > { %487 = vmatpush.bf16.msra.mxu1 %v818_v7  ;;  %p1040_p3 = pnand %p1039_p1, %p1214_p13  ;;  %p1045_p7 = por %p1044_p8, %p1043_p12 }
  0x41   : > { %548 = vmatpush.bf16.msra.mxu2 %v810_v8 }
  0x42   : > { %p1041_p5 = pneg %p1040_p3 }
  0x43   : > { %391 = vmatpush.bf16.msra.mxu0 %v801_v9 }
  0x44   : > { %488 = vmatpush.bf16.msra.mxu1 %v817_v10  ;;  %p1046_p9 = pnand %p1045_p7, %p1041_p5 }
  0x45   : > { %549 = vmatpush.bf16.msra.mxu2 %v809_v11 }
  0x47   : > { %392 = vmatpush.bf16.msra.mxu0 %v800_v12 }
  0x48   : > { %489 = vmatpush.bf16.msra.mxu1 %v816_v13 }
  0x49   : > { %550 = vmatpush.bf16.msra.mxu2 %v808_v14 }
  0x4b   : > { %393 = vmatpush.bf16.msra.mxu0 %v799_v15 }
  0x4c   : > { %490 = vmatpush.bf16.msra.mxu1 %v815_v16 }
  0x4d   : > { %551 = vmatpush.bf16.msra.mxu2 %v807_v17 }
  0x4f   : > { %394 = vmatpush.bf16.msra.mxu0 %v798_v18 }
  0x50   : > { %491 = vmatpush.bf16.msra.mxu1 %v814_v19 }
  0x51   : > { %552 = vmatpush.bf16.msra.mxu2 %v806_v22 }
  0x53   : > { %395 = vmatpush.bf16.msra.mxu0 %v797_v20 }
  0x54   : > { %492 = vmatpush.bf16.msra.mxu1 %v813_v23 }
  0x55   : > { %553 = vmatpush.bf16.msra.mxu2 %v805_v24 }
  0x56   : > { %396 = vmatmul.bf16.vlgmr.msra.gmra.mxu0 %v319_v21 }
  0x57   : > { %493 = vmatmul.bf16.vlgmr.msra.gmra.mxu1 %v319_v21 }
  0xd3   : > { %v397_v26 = vpop.f32.mrf.mxu0 }
  0xd4   : > { %v398_v27 = vadd.f32 %v900_v25, %v397_v26  ;;  %v494_v32 = vpop.f32.mrf.mxu1 }
  0xd6   : > { %v402_v28 = vmul.f32 0.01, %v398_v27  ;;  %vm401_vm0 = vcmp.ge.f32.partialorder %v398_v27, 0.0 }
  0xd8   : > { %v403_v29 = vsel %vm401_vm0, %v398_v27, %v402_v28 }
  0xd9   : > { %v404_v30 = vpack.c.bf16 %v403_v29, %v403_v29 }
  0xdb   : > { %v399_v31 = vpop.f32.mrf.mxu0  ;;  %554 = vmatmul.bf16.vlgmr.msra.gmra.mxu2 %v404_v30 }
  0xdc   : > { %v496_v33 = vpop.f32.mrf.mxu1 }
 0x15e   : > { %v555_v35 = vpop.f32.mrf.mxu2 }
 0x15f   : > { %v556_v36 = vadd.f32 %v555_v35, %v494_v32 }
 0x161   : > { %v563_v37 = vadd.f32 %v901_v34, %v556_v36 }
 0x163   : > { %vm564_vm1 = vcmp.ge.f32.partialorder %v563_v37, 0.0  ;;  %v565_v38 = vmul.f32 0.01, %v563_v37 }
 0x165   : > { %v566_v39 = vsel %vm564_vm1, %v563_v37, %v565_v38 }
 0x166   : > { %v557_v40 = vpop.f32.mrf.mxu2  ;;  %567 = vst [vmem:[%s318_s15] sm:$0xff] %v566_v39 }
 0x167   : > { %1049 = shalt.err (!%p1046_p9)
}
 0x168   : > { %835 = dma.vmem_to_hbm [thread:$0]  (%p1214_p13), %s582_s16, 128, %s584_s18, %s569_s28  }
 0x169 PF: > { %s595_s10 = sand.u32 1, %s1084_s21   ;;  %p1317_p10 = scmp.ge.s32.totalorder %s1096_s24, 2 }
 0x16a   : > { %s596_s25 = scalar_lea.sflag [#allocation4], %s595_s10 }
 0x16b   : > { %p852_p11 = pnand %p1317_p10, %p1219_p4 }
 0x16d   : > { %p853_p0 = pneg %p852_p11 }
 0x16f   : > { %1079 = dma.done.wait (%p853_p0), %s596_s25, 128  }
 0x170   : > { %1081 = vsyncadd (%p853_p0), %s596_s25, 4294967168  ;;  %p21_p2 = scmp.ge.s32.totalorder %s1194_s26, 4   ;;  %s1318_s21 = smov %s1088_s22 }
 0x171   : > { %s1319_s22 = smov %s1092_s23  ;;  %s1320_s23 = smov %s1206_s7 }
 0x172   : > { %s1321_s24 = smov %s1194_s26  ;;  %23 = sbr.rel (!%p21_p2) target bundleno = 7 (0x7), region = 101 }
 0x177   :  { %602 = vsyncpa [#allocation3], 1 }
 0x178   :  { %604 = vsyncpa [#allocation3 + $0x1], 1 }
 0x179   :  { %605 = vsyncpa [#allocation6], 1 }
 0x17a   :  { %606 = vsyncpa [#allocation9], 1 }
 0x17b   :  { %607 = vsyncpa [#allocation4], 1 }
 0x17c   :  { %609 = vsyncpa [#allocation4 + $0x1], 1 }

</bundles_post_ra>
